<compile_context>
chip_gen: v6e
topology: v6e:2x2x1
jax: 0.10.0
libtpu: 0.0.40
codegen_flags: <defaults>
</compile_context>

<pallas_src>
from functools import partial

import jax
import jax.numpy as jnp
from jax.experimental import pallas as pl
from jax.experimental.pallas import tpu as pltpu

EPS = 1e-8


# ----------------------------------------------------------------------------
# Generation-aware hardware queries (with safe fallbacks).
# ----------------------------------------------------------------------------
def _vmem_capacity_bytes():
    """Physical VMEM on the current chip (falls back to the smallest, v7x's 64 MiB)."""
    try:
        return int(pltpu.get_tpu_info().vmem_capacity_bytes)
    except Exception:
        return 64 * 1024 * 1024


def _fused_vmem_cap():
    # Use at most ~72% of physical VMEM for the fused (whole-slab) path:
    # ~92 MiB on v5e/v6e (128 MiB VMEM), ~46 MiB on v7x (64 MiB VMEM).
    return int(0.72 * _vmem_capacity_bytes())


def _is_multicore_chip():
    # v7x has 2 TensorCores per chip; v5e/v6e have 1.
    try:
        return "v7" in jax.devices()[0].device_kind.lower()
    except Exception:
        return False


# ----------------------------------------------------------------------------
# Fused path: one whole [1, N, K] slab per grid step (read once, write once).
# ----------------------------------------------------------------------------
def _gln_fused_kernel(y_ref, gamma_ref, beta_ref, out_ref, *, inv_n):
    # Single stats sweep: sum & sum-of-squares in one read; var = E[x^2] - mean^2.
    # No full-size `centered` temp is ever bound.
    y = y_ref[...].astype(jnp.float32)                       # [1, N, K]
    mean = jnp.sum(y) * inv_n                                 # global mean over (N, K)
    var = jnp.maximum(jnp.sum(y * y) * inv_n - mean * mean, 0.0)
    rstd = jax.lax.rsqrt(var + EPS)                           # EUP (free slot)
    # Fold the affine: out = a*y + c with per-channel [1, N, 1] coefficients.
    a = gamma_ref[...].astype(jnp.float32) * rstd
    c = beta_ref[...].astype(jnp.float32) - a * mean
    out_ref[...] = (y * a + c).astype(out_ref.dtype)


def _fused_vmem_need(N, K, itemsize):
    slab = N * K
    need = 4 * slab * itemsize            # 2x double-buffered input + 2x output slabs
    if itemsize < 4:
        need += 4 * slab                  # f32 upcast temp for sub-32-bit inputs
    return need + 8 * N * 4 + (2 << 20)   # gamma/beta + headroom


def _gln_fused(y, gamma, beta):
    B, N, K = y.shape
    itemsize = y.dtype.itemsize
    vmem_limit = int(min(max(_fused_vmem_need(N, K, itemsize), 32 << 20), _fused_vmem_cap()))
    cost = pl.CostEstimate(
        flops=5 * B * N * K,
        transcendentals=B,
        bytes_accessed=2 * B * N * K * itemsize + 2 * N * 4,
    )
    return pl.pallas_call(
        partial(_gln_fused_kernel, inv_n=1.0 / float(N * K)),
        out_shape=jax.ShapeDtypeStruct((B, N, K), y.dtype),
        grid=(B,),
        in_specs=[
            pl.BlockSpec((1, N, K), lambda b: (b, 0, 0)),   # per-batch slab, pipelined over B
            pl.BlockSpec((1, N, 1), lambda b: (0, 0, 0)),   # gamma (resident)
            pl.BlockSpec((1, N, 1), lambda b: (0, 0, 0)),   # beta  (resident)
        ],
        out_specs=pl.BlockSpec((1, N, K), lambda b: (b, 0, 0)),  # lane-dense: K on lanes
        compiler_params=pltpu.CompilerParams(
            dimension_semantics=("parallel",),              # v7x: shard batch across 2 TCs
            vmem_limit_bytes=vmem_limit,
        ),
        cost_estimate=cost,
    )(y, gamma, beta)


# ----------------------------------------------------------------------------
# Tiled two-pass path for slabs that do not fit the VMEM budget (and B==1 on v7x).
# Pass 1: per-batch sum / sum-of-squares over K tiles -> mean, rstd.
# Pass 2: folded affine apply (out = a*y + c) tile by tile.
# ----------------------------------------------------------------------------
def _gln_stats_kernel(y_ref, mean_ref, rstd_ref, sum_ref, sumsq_ref, *, inv_n):
    kt = pl.program_id(1)

    @pl.when(kt == 0)
    def _():
        sum_ref[...] = jnp.zeros_like(sum_ref)
        sumsq_ref[...] = jnp.zeros_like(sumsq_ref)

    y = y_ref[...].astype(jnp.float32)              # [1, N, TK]
    sum_ref[...] += jnp.sum(y, keepdims=True)       # [1, 1, 1]
    sumsq_ref[...] += jnp.sum(y * y, keepdims=True)

    @pl.when(kt == pl.num_programs(1) - 1)
    def _():
        mean = sum_ref[...] * inv_n
        var = jnp.maximum(sumsq_ref[...] * inv_n - mean * mean, 0.0)
        mean_ref[...] = mean
        rstd_ref[...] = jax.lax.rsqrt(var + EPS)


def _gln_apply_kernel(y_ref, a_ref, c_ref, out_ref):
    # Folded affine: out = a*y + c  (a, c: [1, N, 1] per-batch, per-channel)
    y = y_ref[...].astype(jnp.float32)              # [1, N, TK]
    out_ref[...] = (y * a_ref[...] + c_ref[...]).astype(out_ref.dtype)


def _gln_tiled(y, gamma, beta, tk):
    B, N, K = y.shape
    itemsize = y.dtype.itemsize
    n_kt = K // tk

    vmem_cap = int(0.75 * _vmem_capacity_bytes())
    tile_in = N * tk * itemsize
    tile_f32 = N * tk * 4
    stats_limit = int(min(vmem_cap, max(2 * tile_in + tile_f32 + (2 << 20), 32 << 20)))
    apply_limit = int(min(vmem_cap, max(4 * tile_in + tile_f32 + 8 * N * 4 + (2 << 20), 32 << 20)))

    mean, rstd = pl.pallas_call(
        partial(_gln_stats_kernel, inv_n=1.0 / float(N * K)),
        out_shape=(
            jax.ShapeDtypeStruct((B, 1, 1), jnp.float32),
            jax.ShapeDtypeStruct((B, 1, 1), jnp.float32),
        ),
        grid=(B, n_kt),
        in_specs=[pl.BlockSpec((1, N, tk), lambda b, k: (b, 0, k))],
        out_specs=(
            pl.BlockSpec((1, 1, 1), lambda b, k: (b, 0, 0)),
            pl.BlockSpec((1, 1, 1), lambda b, k: (b, 0, 0)),
        ),
        scratch_shapes=[
            pltpu.VMEM((1, 1, 1), jnp.float32),     # running sum
            pltpu.VMEM((1, 1, 1), jnp.float32),     # running sum of squares
        ],
        compiler_params=pltpu.CompilerParams(
            dimension_semantics=("parallel", "arbitrary"),  # reduction axis last
            vmem_limit_bytes=stats_limit,
        ),
    )(y)

    # Fold the affine outside the kernels (tiny jnp ops on [B, N, 1]):
    #   out = a*y + c, a = gamma*rstd, c = beta - a*mean
    a = gamma.astype(jnp.float32) * rstd
    c = beta.astype(jnp.float32) - a * mean

    return pl.pallas_call(
        _gln_apply_kernel,
        out_shape=jax.ShapeDtypeStruct((B, N, K), y.dtype),
        grid=(B, n_kt),
        in_specs=[
            pl.BlockSpec((1, N, tk), lambda b, k: (b, 0, k)),
            pl.BlockSpec((1, N, 1), lambda b, k: (b, 0, 0)),
            pl.BlockSpec((1, N, 1), lambda b, k: (b, 0, 0)),
        ],
        out_specs=pl.BlockSpec((1, N, tk), lambda b, k: (b, 0, k)),  # lane-dense
        compiler_params=pltpu.CompilerParams(
            dimension_semantics=("parallel", "parallel"),
            vmem_limit_bytes=apply_limit,
        ),
    )(y, a, c)


def _pick_tk(N, K, itemsize):
    """Largest lane-dense (multiple of 128) tile of K that divides K and fits the budget."""
    # Generation-tuned budget: bigger per-step blocks amortize the ~0.35us per-step overhead
    # (matters most on v7x's 3.2 TB/s HBM).
    budget = max(16 << 20, int(0.30 * _vmem_capacity_bytes()))
    per_row = N * max(itemsize, 4)
    best, t = None, 128
    while t <= K:
        if K % t == 0 and 4 * t * per_row <= budget:
            best = t
        t += 128
    return best


# ----------------------------------------------------------------------------
# Public wrapper (forward of GlobalLayerNorm).
# ----------------------------------------------------------------------------
def global_layer_norm(y, gamma, beta, *, tk=None):
    """y: [B, N, K]; gamma, beta: [1, N, 1] (PyTorch parameter layout)."""
    B, N, K = y.shape
    itemsize = y.dtype.itemsize
    if tk is None:
        fused_ok = _fused_vmem_need(N, K, itemsize) <= _fused_vmem_cap()
        # On v7x (2 TensorCores) a B==1 fused call leaves one core idle; the tiled
        # path's K-parallel apply grid shards across both cores.
        prefer_tiled_b1 = (B == 1) and _is_multicore_chip() and (K >= 4096)
        if fused_ok and not prefer_tiled_b1:
            return _gln_fused(y, gamma, beta)
        tk = _pick_tk(N, K, itemsize)
        if tk is None:
            if fused_ok:
                return _gln_fused(y, gamma, beta)
            # TODO(synk): K with no lane-dense divisor and a slab too big for VMEM
            # would need masked remainder tiles; not needed for USEV shapes.
            raise NotImplementedError("pad K to a multiple of 128 for the tiled path")
    if K % tk != 0:
        raise ValueError(f"tk={tk} must divide K={K}")
    return _gln_tiled(y, gamma, beta, tk)


if __name__ == "__main__":
    key = jax.random.PRNGKey(0)
    k_y, k_g = jax.random.split(key)

    # Small shapes consistent with gLN input [M, N, K]
    B, N, K = 2, 32, 256
    y = jax.random.normal(k_y, (B, N, K), dtype=jnp.float32)
    # reset_parameters gives gamma=1, beta=0; perturb to exercise the affine path.
    gamma = jnp.ones((1, N, 1), jnp.float32) + 0.1 * jax.random.normal(k_g, (1, N, 1), jnp.float32)
    beta = jnp.full((1, N, 1), 0.05, jnp.float32)

    def ref_gln(y, gamma, beta):
        mean = jnp.mean(jnp.mean(y, axis=1, keepdims=True), axis=2, keepdims=True)
        var = jnp.mean(jnp.mean((y - mean) ** 2, axis=1, keepdims=True), axis=2, keepdims=True)
        return gamma * (y - mean) / jnp.sqrt(var + EPS) + beta

    ref = ref_gln(y, gamma, beta)

    # Fused path (default for these shapes): read once, write once per batch slab.
    out_fused = jax.block_until_ready(_gln_fused(y, gamma, beta))
    assert out_fused.shape == (B, N, K), out_fused.shape
    assert jnp.allclose(out_fused, ref, atol=1e-4, rtol=1e-4), float(jnp.max(jnp.abs(out_fused - ref)))

    # Dispatcher (picks the fused path here).
    out_auto = jax.block_until_ready(global_layer_norm(y, gamma, beta))
    assert jnp.allclose(out_auto, ref, atol=1e-4, rtol=1e-4), float(jnp.max(jnp.abs(out_auto - ref)))

    # Also exercise the K-tiled two-pass path (used for slabs exceeding the VMEM budget).
    out_tiled = jax.block_until_ready(global_layer_norm(y, gamma, beta, tk=128))
    assert jnp.allclose(out_tiled, ref, atol=1e-4, rtol=1e-4), float(jnp.max(jnp.abs(out_tiled - ref)))

    print("KERNEL_OK")
</pallas_src>

<mosaic_0001>
module attributes {stable_mosaic.version = 11 : i64} {
  func.func @_gln_fused_kernel(%arg0: i32, %arg1: memref<1x32x256xf32, #tpu.memory_space<vmem>>, %arg2: memref<1x32x1xf32, #tpu.memory_space<vmem>>, %arg3: memref<1x32x1xf32, #tpu.memory_space<vmem>>, %arg4: memref<1x32x256xf32, #tpu.memory_space<vmem>>) attributes {dimension_semantics = [#tpu.dimension_semantics<parallel>], iteration_bounds = array<i64: 2>, scalar_prefetch = 0 : i64, scratch_operands = 0 : i64, tpu.core_type = #tpu.core_type<tc>, window_params = [{transform_indices = @transform_0, window_bounds = array<i64: 1, 32, 256>}, {pipeline_mode = #tpu.pipeline_mode<synchronous>, transform_indices = @transform_1, window_bounds = array<i64: 1, 32, 1>}, {pipeline_mode = #tpu.pipeline_mode<synchronous>, transform_indices = @transform_2, window_bounds = array<i64: 1, 32, 1>}, {transform_indices = @transform_3, window_bounds = array<i64: 1, 32, 256>}]} {
    %c0 = arith.constant 0 : index
    %c0_0 = arith.constant 0 : index
    %c0_1 = arith.constant 0 : index
    %0 = vector.load %arg1[%c0, %c0_0, %c0_1] : memref<1x32x256xf32, #tpu.memory_space<vmem>>, vector<1x32x256xf32>
    %1 = vector.shape_cast %0 : vector<1x32x256xf32> to vector<1x1x32x256xf32>
    %cst = arith.constant dense<0.000000e+00> : vector<1xf32>
    %2 = vector.multi_reduction <add>, %1, %cst [1, 2, 3] : vector<1x1x32x256xf32> to vector<1xf32>
    %3 = vector.shape_cast %2 : vector<1xf32> to vector<1x1x1x1xf32>
    %4 = vector.extract %3[0, 0, 0, 0] : f32 from vector<1x1x1x1xf32>
    %cst_2 = arith.constant 1.22070313E-4 : f32
    %5 = arith.mulf %4, %cst_2 : f32
    %6 = arith.mulf %0, %0 : vector<1x32x256xf32>
    %7 = vector.shape_cast %6 : vector<1x32x256xf32> to vector<1x1x32x256xf32>
    %cst_3 = arith.constant dense<0.000000e+00> : vector<1xf32>
    %8 = vector.multi_reduction <add>, %7, %cst_3 [1, 2, 3] : vector<1x1x32x256xf32> to vector<1xf32>
    %9 = vector.shape_cast %8 : vector<1xf32> to vector<1x1x1x1xf32>
    %10 = vector.extract %9[0, 0, 0, 0] : f32 from vector<1x1x1x1xf32>
    %cst_4 = arith.constant 1.22070313E-4 : f32
    %11 = arith.mulf %10, %cst_4 : f32
    %12 = arith.mulf %5, %5 : f32
    %13 = arith.subf %11, %12 : f32
    %cst_5 = arith.constant 0.000000e+00 : f32
    %14 = arith.maximumf %13, %cst_5 : f32
    %cst_6 = arith.constant 9.99999993E-9 : f32
    %15 = arith.addf %14, %cst_6 : f32
    %16 = math.rsqrt %15 : f32
    %c0_7 = arith.constant 0 : index
    %c0_8 = arith.constant 0 : index
    %c0_9 = arith.constant 0 : index
    %17 = vector.load %arg2[%c0_7, %c0_8, %c0_9] : memref<1x32x1xf32, #tpu.memory_space<vmem>>, vector<1x32x1xf32>
    %18 = vector.broadcast %16 : f32 to vector<1x32x1xf32>
    %19 = arith.mulf %17, %18 : vector<1x32x1xf32>
    %c0_10 = arith.constant 0 : index
    %c0_11 = arith.constant 0 : index
    %c0_12 = arith.constant 0 : index
    %20 = vector.load %arg3[%c0_10, %c0_11, %c0_12] : memref<1x32x1xf32, #tpu.memory_space<vmem>>, vector<1x32x1xf32>
    %21 = vector.broadcast %5 : f32 to vector<1x32x1xf32>
    %22 = arith.mulf %19, %21 : vector<1x32x1xf32>
    %23 = arith.subf %20, %22 : vector<1x32x1xf32>
    %24 = vector.broadcast %19 : vector<1x32x1xf32> to vector<1x32x256xf32>
    %25 = arith.mulf %0, %24 : vector<1x32x256xf32>
    %26 = vector.broadcast %23 : vector<1x32x1xf32> to vector<1x32x256xf32>
    %27 = arith.addf %25, %26 : vector<1x32x256xf32>
    %c0_13 = arith.constant 0 : index
    %c0_14 = arith.constant 0 : index
    %c0_15 = arith.constant 0 : index
    %28 = vector.load %arg4[%c0_13, %c0_14, %c0_15] : memref<1x32x256xf32, #tpu.memory_space<vmem>>, vector<1x32x256xf32>
    tpu.vector_store %arg4[%c0_13, %c0_14, %c0_15], %27 {strides = array<i32>} : memref<1x32x256xf32, #tpu.memory_space<vmem>>, vector<1x32x256xf32>,
    return
  }
  func.func @transform_0(%arg0: i32) -> (i32, i32, i32) {
    %c0_i32 = arith.constant 0 : i32
    %c0_i32_0 = arith.constant 0 : i32
    %c0_i32_1 = arith.constant 0 : i32
    return %arg0, %c0_i32, %c0_i32_0 : i32, i32, i32
  }
  func.func @transform_1(%arg0: i32) -> (i32, i32, i32) {
    %c0_i32 = arith.constant 0 : i32
    %c0_i32_0 = arith.constant 0 : i32
    %c0_i32_1 = arith.constant 0 : i32
    %c0_i32_2 = arith.constant 0 : i32
    return %c0_i32, %c0_i32_0, %c0_i32_1 : i32, i32, i32
  }
  func.func @transform_2(%arg0: i32) -> (i32, i32, i32) {
    %c0_i32 = arith.constant 0 : i32
    %c0_i32_0 = arith.constant 0 : i32
    %c0_i32_1 = arith.constant 0 : i32
    %c0_i32_2 = arith.constant 0 : i32
    return %c0_i32, %c0_i32_0, %c0_i32_1 : i32, i32, i32
  }
  func.func @transform_3(%arg0: i32) -> (i32, i32, i32) {
    %c0_i32 = arith.constant 0 : i32
    %c0_i32_0 = arith.constant 0 : i32
    %c0_i32_1 = arith.constant 0 : i32
    return %arg0, %c0_i32, %c0_i32_0 : i32, i32, i32
  }
}

</mosaic_0001>

<bundles_post_ra>
// kernel: tpu_custom_call.1
= control target key start
LH: loop header
LB: loop body
LE: loop exit
PB: predicated region body
PF: predicated region fallthrough
CT: control target
= control target key end

     0   :  { %8 = vsyncpa [#allocation3], 0  ;;  %s849_s0 = inlined_call_operand.hbm [shape: f32[2,32,256], index: 0, kind: input, shape index: {}]   ;;  %s850_s1 = inlined_call_operand.vmem [shape: f32[1,32,1], index: 1, kind: input, shape index: {}]   ;;  %s851_s2 = inlined_call_operand.vmem [shape: f32[1,32,1], index: 2, kind: input, shape index: {}]   ;;  %s852_s3 = inlined_call_operand.hbm [shape: f32[2,32,256], index: 3, kind: output, shape index: {}]  }
   0x1   :  { %10 = vsyncpa [#allocation3 + $0x1], 0 }
   0x2   :  { %11 = vsyncpa [#allocation4], 0 }
   0x3   :  { %13 = vsyncpa [#allocation4 + $0x1], 0  ;;  %s619_s12 = smov 0   ;;  %s621_s13 = smov 0  }
   0x4   :  { %s623_s14 = smov 0   ;;  %s625_s15 = smov 0  }
   0x5 LB: > { %s640_s16 = sadd.s32 4294967295, %s589_s15   ;;  %s419_s17 = sadd.s32 4294967294, %s589_s15   ;;  %s589_s15 = sphi %s625_s15, %s867_s15   ;;  %s585_s14 = sphi %s623_s14, %s866_s14   ;;  %s581_s13 = sphi %s621_s13, %s865_s13   ;;  %s577_s12 = sphi %s619_s12, %s864_s12  }
   0x6   : > { %s644_s18 = sadd.s32 1, %s589_s15   ;;  %s26_s19 = sadd.s32 1, %s585_s14 }
   0x7   : > { %s23_s20 = ssub.s32 %s589_s15, %s644_s18  ;;  %p33_p0 = scmp.ne.s32.totalorder %s585_s14, %s581_s13 }
   0x8   : > { %p24_p1 = scmp.eq.s32.totalorder %s23_s20, 0  ;;  %p34_p2 = scmp.eq.s32.totalorder %s589_s15, 0 }
   0x9   : > { %p39_p3 = scmp.ne.s32.totalorder %s581_s13, %s577_s12  ;;  %p40_p4 = scmp.eq.s32.totalorder %s640_s16, 0 }
   0xa   : > { %s656_s21 = scalar_select %p24_p1, %s585_s14, %s26_s19  }
   0xb   : > { %p658_p5 = por %p34_p2, %p33_p0  ;;  %p662_p6 = por %p40_p4, %p39_p3 }
   0xc   : > { %p105_p7 = scmp.eq.s32.totalorder %s640_s16, 1  ;;  %p111_p8 = scmp.eq.s32.totalorder %s419_s17, 1 }
   0xd   : > { %s856_s23 = scalar_select %p662_p6, 1, 0 }
   0xe   : > { %p453_p10 = scmp.lt.s32.totalorder %s589_s15, 2  ;;  %p669_p11 = por %p105_p7, %p33_p0 }
   0xf   : > { %p673_p12 = por %p111_p8, %p39_p3  ;;  %s137_s26 = sand.u32 1, %s585_s14  }
  0x10   : > { %s857_s24 = scalar_select %p669_p11, 1, 0 }
  0x11   : > { %s858_s25 = scalar_select %p673_p12, 1, 0 }
  0x12   : > { %s433_s27 = sshll.u32 %s589_s15, 10  ;;  %s422_s28 = sshll.u32 %s137_s26, 6 }
  0x13   : > { %s682_s4 = scalar_lea.hbm %s849_s0, %s433_s27  ;;  %s141_s5 = scalar_lea.vmem [#allocation2], %s422_s28 }
  0x14   : > { %s148_s6 = sshll.u32 %s141_s5, 4  ;;  %p686_p13 = pnand %p453_p10, %p658_p5  ;;  %s690_s6 = int_to_ptr.vmem [resolvable:$true] %s148_s6 }
  0x15   : > { %s692_s8 = scalar_lea.sflag [#allocation3], %s137_s26  ;;  %s497_s9 = scalar_lea.hbm %s682_s4, 1024 }
  0x16   : > { %p498_p0 = scmp.ne.s32.totalorder %s682_s4, %s497_s9  ;;  %p499_p1 = pneg %p686_p13 }
  0x17   : > { %s502_s17 = scalar_lea.hbm %s849_s0, 2048  ;;  %p503_p4 = scmp.lt.s32.totalorder %s682_s4, %s849_s0 }
  0x18   : > { %p500_p2 = pnand %p499_p1, %p498_p0  ;;  %p504_p5 = scmp.lt.s32.totalorder %s502_s17, %s497_s9 }
  0x1a   : > { %p501_p3 = pneg %p500_p2  ;;  %p505_p7 = por %p504_p5, %p503_p4 }
  0x1c   : > { %p506_p8 = pnand %p505_p7, %p501_p3 }
  0x1e   : > { %509 = shalt.err (!%p506_p8)
}
  0x1f   : > { %s510_s22 = scalar_lea.vmem %s690_s6, 1024  ;;  %s591_s26 = smov [#allocation2]  }
  0x20   : > { %p511_p10 = scmp.ne.s32.totalorder %s690_s6, %s510_s22  ;;  %s515_s27 = sshll.u32 %s591_s26, 4  ;;  %s516_s27 = int_to_ptr.vmem [resolvable:$false] %s515_s27 }
  0x21   : > { %s517_s28 = scalar_lea.vmem %s516_s27, 2048  ;;  %p518_p2 = scmp.lt.s32.totalorder %s690_s6, %s516_s27 }
  0x22   : > { %p513_p9 = pnand %p511_p10, %p499_p1  ;;  %p519_p12 = scmp.lt.s32.totalorder %s517_s28, %s510_s22 }
  0x24   : > { %p514_p0 = pneg %p513_p9  ;;  %p520_p11 = por %p519_p12, %p518_p2 }
  0x26   : > { %p521_p6 = pnand %p520_p11, %p514_p0 }
  0x28   : > { %524 = shalt.err (!%p521_p6)
}
  0x29   : > { %s592_s29 = smov 256   ;;  %s593_s30 = smov 16  }
  0x2a   : > { %448 = dma.hbm_to_vmem [thread:$0]  (!%p686_p13), %s682_s4, 1024, %s690_s6, %s692_s8, %s592_s29, %s592_s29, %s593_s30  }
  0x2b   : > { %p425_p9 = scmp.ge.s32.totalorder %s589_s15, 1  ;;  %p156_p1 = scmp.lt.s32.totalorder %s589_s15, 3 }
  0x2d   : > { %p157_p3 = pnand %p425_p9, %p156_p1 }
  0x2e   : > { %s716_s5 = sand.u32 (!%p157_p3), 1, %s581_s13   ;;  %p860_p6 = scmp.ne.s32.totalorder (!%p157_p3), %s856_s23, 0 }
  0x2f   : > { %160 = sbr.rel (%p157_p3) target bundleno = 511 (0x1ff), region = 32  ;;  %s426_s9 = sshll.u32 (!%p157_p3), %s716_s5, 6 }
  0x30   : > { %s163_s10 = scalar_lea.sflag (!%p157_p3), [#allocation3], %s716_s5  ;;  %s166_s11 = scalar_lea.vmem (!%p157_p3), [#allocation2], %s426_s9 }
  0x34   : > { %568 = dma.done.wait (%p860_p6), %s163_s10, 1024  }
  0x35   : > { %570 = vsyncadd (%p860_p6), %s163_s10, 4294966272  ;;  %v726_v0 = vld [vmem:[%s166_s11] sm:$0xff]  ;;  %v728_v1 = vld [vmem:[%s166_s11 + $0x8] sm:$0xff]  ;;  %v594_v43 = vmov 0   ;;  %s595_s19 = smov 0.0   ;;  %s188_s27 = scalar_lea.vmem [#allocation5], %s426_s9 }
  0x36   : > { %v730_v2 = vld [vmem:[%s166_s11 + $0x10] sm:$0xff]  ;;  %v197_v3 = vadd.f32 %v728_v1, %v726_v0  ;;  %v214_v4 = vmul.f32 %v726_v0, %v726_v0  ;;  %v215_v5 = vmul.f32 %v728_v1, %v728_v1  ;;  %v740_v7 = vld [vmem:[%s166_s11 + $0x18] sm:$0xff]  ;;  %v745_v11 = vld [vmem:[%s166_s11 + $0x20] sm:$0xff]  ;;  %494 = vset.pattern.permute.xlu0 %v594_v43  ;;  %493 = vset.pattern.permute.xlu1 %v594_v43  ;;  %s346_s28 = sshll.u32 %s188_s27, 4  ;;  %s434_s29 = sshll.u32 %s640_s16, 10  ;;  %s801_s28 = int_to_ptr.vmem [resolvable:$true] %s346_s28 }
  0x37   : > { %v216_v6 = vmul.f32 %v730_v2, %v730_v2  ;;  %v217_v9 = vmul.f32 %v740_v7, %v740_v7  ;;  %v218_v13 = vmul.f32 %v745_v11, %v745_v11  ;;  %v750_v15 = vld [vmem:[%s166_s11 + $0x28] sm:$0xff]  ;;  %v755_v19 = vld [vmem:[%s166_s11 + $0x30] sm:$0xff]  ;;  %v760_v23 = vld [vmem:[%s166_s11 + $0x38] sm:$0xff]  ;;  %s806_s10 = scalar_lea.hbm %s852_s3, %s434_s29  ;;  %s333_s16 = scalar_lea.sflag [#allocation4], %s716_s5 }
  0x38   : > { %v198_v8 = vadd.f32 %v197_v3, %v730_v2  ;;  %v222_v10 = vadd.f32 %v215_v5, %v214_v4  ;;  %v219_v17 = vmul.f32 %v750_v15, %v750_v15  ;;  %v220_v21 = vmul.f32 %v755_v19, %v755_v19  ;;  %v248_v47 = vld [vmem:[%s850_s1 + $0x10] sm:$0xff]  ;;  %v246_v48 = vld [vmem:[%s850_s1] sm:$0xff]  ;;  %v247_v52 = vld [vmem:[%s850_s1 + $0x8] sm:$0xff]  ;;  %s525_s11 = scalar_lea.vmem %s801_s28, 1024  ;;  %p861_p12 = scmp.ne.s32.totalorder %s857_s24, 0 }
  0x39   : > { %v221_v25 = vmul.f32 %v760_v23, %v760_v23  ;;  %v249_v54 = vld [vmem:[%s850_s1 + $0x18] sm:$0xff]  ;;  %v255_v58 = vld [vmem:[%s851_s2] sm:$0xff]  ;;  %v256_v61 = vld [vmem:[%s851_s2 + $0x8] sm:$0xff]  ;;  %p526_p11 = scmp.ne.s32.totalorder %s801_s28, %s525_s11 }
  0x3a   : > { %v199_v12 = vadd.f32 %v198_v8, %v740_v7  ;;  %v223_v14 = vadd.f32 %v222_v10, %v216_v6  ;;  %v257_v3 = vld [vmem:[%s851_s2 + $0x10] sm:$0xff]  ;;  %v258_v6 = vld [vmem:[%s851_s2 + $0x18] sm:$0xff] }
  0x3b   : > { %p527_p13 = pnand %p526_p11, %p861_p12 }
  0x3c   : > { %v200_v16 = vadd.f32 %v199_v12, %v745_v11  ;;  %v224_v18 = vadd.f32 %v223_v14, %v217_v9 }
  0x3d   : > { %p528_p4 = pneg %p527_p13 }
  0x3e   : > { %v201_v20 = vadd.f32 %v200_v16, %v750_v15  ;;  %v225_v22 = vadd.f32 %v224_v18, %v218_v13 }
  0x40   : > { %v202_v24 = vadd.f32 %v201_v20, %v755_v19  ;;  %v226_v26 = vadd.f32 %v225_v22, %v219_v17 }
  0x42   : > { %v203_v27 = vadd.f32 %v202_v24, %v760_v23  ;;  %v227_v28 = vadd.f32 %v226_v26, %v220_v21 }
  0x44   : > { %204 = vadd.xlane.f32.xlu0 %v203_v27  ;;  %v228_v29 = vadd.f32 %v227_v28, %v221_v25 }
  0x48   : > { %229 = vadd.xlane.f32.xlu0 %v228_v29 }
  0xcd   : > { %v205_v30 = vpop.xlane.xlu0 %204 }
  0xce   : > { %v206_v31 = vrot.slane %v205_v30, 4 }
  0xd0   : > { %v207_v32 = vadd.f32 %v206_v31, %v205_v30 }
  0xd1   : > { %v230_v33 = vpop.xlane.xlu0 %229 }
  0xd2   : > { %v208_v34 = vrot.slane %v207_v32, 2  ;;  %v231_v35 = vrot.slane %v230_v33, 4 }
  0xd4   : > { %v232_v36 = vadd.f32 %v231_v35, %v230_v33  ;;  %v209_v37 = vadd.f32 %v208_v34, %v207_v32 }
  0xd6   : > { %v233_v38 = vrot.slane %v232_v36, 2  ;;  %v210_v39 = vrot.slane %v209_v37, 1 }
  0xd8   : > { %v211_v40 = vadd.f32 %v210_v39, %v209_v37  ;;  %v234_v41 = vadd.f32 %v233_v38, %v232_v36 }
  0xda   : > { %435 = vpush %v211_v40  ;;  %v235_v42 = vrot.slane %v234_v41, 1 }
  0xdc   : > { %v236_v44 = vadd.f32 %v235_v42, %v234_v41 }
  0xde   : > { %437 = vpush %v236_v44 }
 0x10b   : > { %s436_s23 = spop %435 }
 0x10c   : > { %s213_s4 = smul.f32 0.00012207031, %s436_s23  ;;  %s596_s23 = smov [#allocation5]  }
 0x10e   : > { %s239_s6 = smul.f32 %s213_s4, %s213_s4  ;;  %v259_v55 = vstv %s213_s4 }
 0x10f   : > { %s438_s7 = spop %437 }
 0x110   : > { %s238_s8 = smul.f32 0.00012207031, %s438_s7 }
 0x112   : > { %s240_s17 = ssub.f32 %s238_s8, %s239_s6  ;;  %s529_s6 = sshll.u32 %s596_s23, 4  ;;  %s530_s6 = int_to_ptr.vmem [resolvable:$false] %s529_s6 }
 0x113   : > { %s531_s7 = scalar_lea.vmem %s530_s6, 2048  ;;  %p532_p5 = scmp.lt.s32.totalorder %s801_s28, %s530_s6 }
 0x114   : > { %s241_s20 = smax.f32 %s595_s19, %s240_s17  ;;  %p533_p7 = scmp.lt.s32.totalorder %s531_s7, %s525_s11 }
 0x115   : > { %s242_s22 = sadd.f32 1e-08, %s241_s20 }
 0x116   : > { %p534_p8 = por %p533_p7, %p532_p5 }
 0x117   : > { %v243_v45 = vstv %s242_s22 }
 0x118   : > { %495 = vrsqrt.f32 %v243_v45  ;;  %p535_p10 = pnand %p534_p8, %p528_p4 }
 0x125   : > { %v496_v46 = vpop.eup %495 }
 0x126   : > { %439 = vpush %v496_v46 }
 0x157   : > { %s440_s30 = spop %439 }
 0x158   : > { %v250_v49 = vstv %s440_s30 }
 0x159   : > { %v253_v50 = vmul.f32 %v250_v49, %v248_v47  ;;  %v251_v51 = vmul.f32 %v250_v49, %v246_v48  ;;  %v252_v53 = vmul.f32 %v250_v49, %v247_v52  ;;  %v254_v56 = vmul.f32 %v250_v49, %v249_v54 }
 0x15b   : > { %280 = vperm.xlu0 %494, %v253_v50   ;;  %270 = vperm.xlu1 %493, %v251_v51   ;;  %v260_v57 = vmul.f32 %v259_v55, %v251_v51  ;;  %v261_v59 = vmul.f32 %v259_v55, %v252_v53  ;;  %v262_v62 = vmul.f32 %v259_v55, %v253_v50 }
 0x15c   : > { %v263_v4 = vmul.f32 %v259_v55, %v254_v56 }
 0x15d   : > { %v264_v60 = vsub.f32 %v255_v58, %v260_v57  ;;  %v265_v63 = vsub.f32 %v256_v61, %v261_v59  ;;  %v266_v5 = vsub.f32 %v257_v3, %v262_v62 }
 0x15e   : > { %v267_v8 = vsub.f32 %v258_v6, %v263_v4 }
 0x15f   : > { %275 = vperm.xlu1 %493, %v252_v53  }
 0x163   : > { %285 = vperm.xlu1 %493, %v254_v56  }
 0x167   : > { %298 = vperm.xlu1 %493, %v264_v60  }
 0x16b   : > { %303 = vperm.xlu1 %493, %v265_v63  }
 0x16f   : > { %308 = vperm.xlu1 %493, %v266_v5  }
 0x173   : > { %313 = vperm.xlu1 %493, %v267_v8  }
 0x1d6   : > { %v271_v9 = vpop.permute.xlu1 %270  ;;  %v281_v22 = vpop.permute.xlu0 %280 }
 0x1d7   : > { %v288_v13 = vmul.f32 %v271_v9, %v726_v0  ;;  %v289_v14 = vmul.f32 %v271_v9, %v728_v1  ;;  %v292_v0 = vmul.f32 %v281_v22, %v745_v11  ;;  %v293_v1 = vmul.f32 %v281_v22, %v750_v15 }
 0x1da   : > { %v276_v10 = vpop.permute.xlu1 %275 }
 0x1db   : > { %v290_v20 = vmul.f32 %v276_v10, %v730_v2  ;;  %v291_v21 = vmul.f32 %v276_v10, %v740_v7 }
 0x1de   : > { %v286_v12 = vpop.permute.xlu1 %285 }
 0x1df   : > { %v294_v28 = vmul.f32 %v286_v12, %v755_v19  ;;  %v295_v29 = vmul.f32 %v286_v12, %v760_v23 }
 0x1e2   : > { %v299_v16 = vpop.permute.xlu1 %298 }
 0x1e3   : > { %v316_v17 = vadd.f32 %v299_v16, %v288_v13  ;;  %v317_v18 = vadd.f32 %v299_v16, %v289_v14 }
 0x1e5   : > { %324 = vst [vmem:[%s188_s27] sm:$0xff] %v316_v17  ;;  %325 = vst [vmem:[%s188_s27 + $0x8] sm:$0xff] %v317_v18 }
 0x1e6   : > { %v304_v24 = vpop.permute.xlu1 %303 }
 0x1e7   : > { %v318_v25 = vadd.f32 %v304_v24, %v290_v20  ;;  %v319_v26 = vadd.f32 %v304_v24, %v291_v21 }
 0x1e9   : > { %326 = vst [vmem:[%s188_s27 + $0x10] sm:$0xff] %v318_v25  ;;  %327 = vst [vmem:[%s188_s27 + $0x18] sm:$0xff] %v319_v26 }
 0x1ea   : > { %v309_v2 = vpop.permute.xlu1 %308 }
 0x1eb   : > { %v320_v27 = vadd.f32 %v309_v2, %v292_v0  ;;  %v321_v7 = vadd.f32 %v309_v2, %v293_v1 }
 0x1ed   : > { %328 = vst [vmem:[%s188_s27 + $0x20] sm:$0xff] %v320_v27  ;;  %329 = vst [vmem:[%s188_s27 + $0x28] sm:$0xff] %v321_v7 }
 0x1ee   : > { %v314_v11 = vpop.permute.xlu1 %313 }
 0x1ef   : > { %v322_v15 = vadd.f32 %v314_v11, %v294_v28  ;;  %v323_v30 = vadd.f32 %v314_v11, %v295_v29 }
 0x1f1   : > { %330 = vst [vmem:[%s188_s27 + $0x30] sm:$0xff] %v322_v15  ;;  %331 = vst [vmem:[%s188_s27 + $0x38] sm:$0xff] %v323_v30 }
 0x1f2   : > { %538 = shalt.err (!%p535_p10)
}
 0x1f3   : > { %s539_s8 = scalar_lea.hbm %s806_s10, 1024  ;;  %s543_s20 = scalar_lea.hbm %s852_s3, 2048 }
 0x1f4   : > { %p540_p0 = scmp.ne.s32.totalorder %s806_s10, %s539_s8  ;;  %p544_p1 = scmp.lt.s32.totalorder %s806_s10, %s852_s3 }
 0x1f5   : > { %p545_p3 = scmp.lt.s32.totalorder %s543_s20, %s539_s8 }
 0x1f6   : > { %p541_p2 = pnand %p540_p0, %p861_p12 }
 0x1f7   : > { %p546_p6 = por %p545_p3, %p544_p1 }
 0x1f8   : > { %p542_p9 = pneg %p541_p2 }
 0x1fa   : > { %p547_p11 = pnand %p546_p6, %p542_p9 }
 0x1fc   : > { %550 = shalt.err (!%p547_p11)
}
 0x1fd   : > { %s597_s26 = smov 256   ;;  %s598_s27 = smov 16  }
 0x1fe   : > { %443 = dma.vmem_to_hbm [thread:$0]  (%p861_p12), %s801_s28, 1024, %s806_s10, %s333_s16, %s597_s26, %s597_s26, %s598_s27  }
 0x1ff PF: > { %s361_s29 = sand.u32 1, %s577_s12   ;;  %p862_p13 = scmp.ne.s32.totalorder %s858_s25, 0 }
 0x200   : > { %p863_p4 = scmp.ge.s32.totalorder %s589_s15, 2  ;;  %s362_s9 = scalar_lea.sflag [#allocation4], %s361_s29 }
 0x202   : > { %p450_p5 = pnand %p863_p4, %p862_p13 }
 0x204   : > { %p451_p7 = pneg %p450_p5 }
 0x206   : > { %572 = dma.done.wait (%p451_p7), %s362_s9, 1024  }
 0x207   : > { %574 = vsyncadd (%p451_p7), %s362_s9, 4294966272  ;;  %p16_p8 = scmp.ge.s32.totalorder %s644_s18, 4   ;;  %s864_s12 = smov %s581_s13 }
 0x208   : > { %s865_s13 = smov %s585_s14  ;;  %s866_s14 = smov %s656_s21 }
 0x209   : > { %s867_s15 = smov %s644_s18  ;;  %18 = sbr.rel (!%p16_p8) target bundleno = 5 (0x5), region = 77 }
 0x20e   :  { %367 = vsyncpa [#allocation3], 1 }
 0x20f   :  { %369 = vsyncpa [#allocation3 + $0x1], 1 }
 0x210   :  { %370 = vsyncpa [#allocation4], 1 }
 0x211   :  { %372 = vsyncpa [#allocation4 + $0x1], 1 }

</bundles_post_ra>
